<compile_context>
chip_gen: v7x
topology: tpu7x:2x2x1
jax: 0.10.0
libtpu: 0.0.40
codegen_flags: <defaults>
</compile_context>

<pallas_src>
import functools

import jax
import jax.numpy as jnp
from jax.experimental import pallas as pl
from jax.experimental.pallas import tpu as pltpu


def _round_up(x, m):
    return (x + m - 1) // m * m


# ----------------------------- Pallas kernels ------------------------------

def _conv_pool_kernel(x00_ref, x01_ref, x10_ref, x11_ref, w_ref, b_ref, o_ref):
    """Fused 3x3 'same' conv (im2col matmul) + bias + ReLU + 2x2/2 max-pool.

    The four x?? slabs hold the im2col rows of the four conv-output positions
    feeding each pooled pixel, so the pool max is free VALU filler in the
    matmul epilogue: relu(max_q(x_q @ w) + b) == pool(relu(conv(x)) ).
    Operands are bf16; accumulation and epilogue are f32.
    """
    w = w_ref[...]
    d00 = jnp.dot(x00_ref[...], w, preferred_element_type=jnp.float32)
    d01 = jnp.dot(x01_ref[...], w, preferred_element_type=jnp.float32)
    d10 = jnp.dot(x10_ref[...], w, preferred_element_type=jnp.float32)
    d11 = jnp.dot(x11_ref[...], w, preferred_element_type=jnp.float32)
    m = jnp.maximum(jnp.maximum(d00, d01), jnp.maximum(d10, d11))
    o_ref[...] = jnp.maximum(m + b_ref[...], 0.0)


def _fc_fused_kernel(x_ref, w1_ref, b1_ref, w2_ref, b2_ref, o_ref):
    """fc1 + ReLU + fc2 fused: the small intermediate never leaves vregs."""
    h = jnp.dot(x_ref[...], w1_ref[...], preferred_element_type=jnp.float32)
    h = jnp.maximum(h + b1_ref[...], 0.0)
    o = jnp.dot(h.astype(jnp.bfloat16), w2_ref[...],
                preferred_element_type=jnp.float32)
    o_ref[...] = o + b2_ref[...]


# ----------------------------- kernel wrappers ------------------------------

def conv3x3_relu_pool(x_nhwc, wp, bp, oc):
    """PyTorch Conv2d(C, oc, 3, padding=1) + ReLU + MaxPool2d(2,2), NHWC in/out.

    x_nhwc: (B, H, W, C) f32.   wp: pre-padded (Kp, OCp) bf16 weight slab with
    K ordered (ki, kj, c).      bp: (1, OCp) f32.   Returns (B, H/2, W/2, oc).
    """
    B, H, W, C = x_nhwc.shape
    OH, OW = H // 2, W // 2
    K = 9 * C
    Kp, OCp = wp.shape
    M = B * OH * OW                         # pooled output rows
    Mp = _round_up(M, 8)

    # --- im2col glue: per-output-pixel 3x3 patches in (ki, kj, c) order ---
    xpad = jnp.pad(x_nhwc, ((0, 0), (1, 1), (1, 1), (0, 0)))
    cols = [xpad[:, ki:ki + H, kj:kj + W, :] for ki in range(3) for kj in range(3)]
    patches = jnp.stack(cols, axis=3).reshape(B, H, W, K)

    def quarter(dy, dx):
        q = patches[:, dy::2, dx::2, :].reshape(M, K)
        q = jnp.pad(q, ((0, Mp - M), (0, Kp - K)))
        return q.astype(jnp.bfloat16)

    quarters = [quarter(0, 0), quarter(0, 1), quarter(1, 0), quarter(1, 1)]

    # Two M-tiles: keeps both v7x TensorCores busy; one extra ~0.35us step on
    # single-TC chips (v5e/v6e), which is negligible here.
    tm = Mp // 2 if (Mp >= 16 and Mp % 16 == 0) else Mp
    grid = (Mp // tm,)

    cost = pl.CostEstimate(
        flops=2 * 4 * Mp * Kp * OCp,
        transcendentals=0,
        bytes_accessed=4 * Mp * Kp * 2 + Kp * OCp * 2 + OCp * 4 + Mp * OCp * 4)

    out = pl.pallas_call(
        _conv_pool_kernel,
        out_shape=jax.ShapeDtypeStruct((Mp, OCp), jnp.float32),
        grid=grid,
        in_specs=[pl.BlockSpec((tm, Kp), lambda i: (i, 0))] * 4
                 + [pl.BlockSpec((Kp, OCp), lambda i: (0, 0)),
                    pl.BlockSpec((1, OCp), lambda i: (0, 0))],
        out_specs=pl.BlockSpec((tm, OCp), lambda i: (i, 0)),
        compiler_params=pltpu.CompilerParams(
            dimension_semantics=("parallel",)),
        cost_estimate=cost,
    )(*quarters, wp, bp)
    return out[:M, :oc].reshape(B, OH, OW, oc)


def fc_head(h_flat, w1p, b1p, w2p, b2p, num_classes):
    """Fused Linear(IN,32)+ReLU then Linear(32,num_classes) in one pallas_call."""
    B, K = h_flat.shape
    Kp, N1p = w1p.shape
    N2p = w2p.shape[1]
    Mp = _round_up(B, 8)
    xp = jnp.pad(h_flat, ((0, Mp - B), (0, Kp - K))).astype(jnp.bfloat16)

    cost = pl.CostEstimate(
        flops=2 * Mp * Kp * N1p + 2 * Mp * N1p * N2p,
        transcendentals=0,
        bytes_accessed=Mp * Kp * 2 + Kp * N1p * 2 + N1p * N2p * 2 + Mp * N2p * 4)

    out = pl.pallas_call(
        _fc_fused_kernel,
        out_shape=jax.ShapeDtypeStruct((Mp, N2p), jnp.float32),
        grid=(1,),
        in_specs=[pl.BlockSpec((Mp, Kp), lambda i: (0, 0)),
                  pl.BlockSpec((Kp, N1p), lambda i: (0, 0)),
                  pl.BlockSpec((1, N1p), lambda i: (0, 0)),
                  pl.BlockSpec((N1p, N2p), lambda i: (0, 0)),
                  pl.BlockSpec((1, N2p), lambda i: (0, 0))],
        out_specs=pl.BlockSpec((Mp, N2p), lambda i: (0, 0)),
        cost_estimate=cost,
    )(xp, w1p, b1p, w2p, b2p)
    return out[:B, :num_classes]


# ------------------------- model (synthetic weights) -----------------------

def init_params(key):
    ks = jax.random.split(key, 8)
    p = {}
    p["conv1_w"] = 0.05 * jax.random.normal(ks[0], (8, 4, 3, 3), jnp.float32)
    p["conv1_b"] = 0.05 * jax.random.normal(ks[1], (8,), jnp.float32)
    p["conv2_w"] = 0.05 * jax.random.normal(ks[2], (16, 8, 3, 3), jnp.float32)
    p["conv2_b"] = 0.05 * jax.random.normal(ks[3], (16,), jnp.float32)
    p["fc1_w"] = 0.05 * jax.random.normal(ks[4], (32, 16 * 4 * 4), jnp.float32)
    p["fc1_b"] = 0.05 * jax.random.normal(ks[5], (32,), jnp.float32)
    p["fc2_w"] = 0.05 * jax.random.normal(ks[6], (10, 32), jnp.float32)
    p["fc2_b"] = 0.05 * jax.random.normal(ks[7], (10,), jnp.float32)
    return p


def prepare_params(p, fc1_chw=(16, 4, 4)):
    """One-time static prep: NHWC-ordered, MXU-padded, bf16 weight slabs."""
    def conv_slabs(w, b):
        OC, C, KH, KW = w.shape
        K = KH * KW * C
        Kp, OCp = _round_up(K, 128), _round_up(OC, 128)
        wm = w.transpose(2, 3, 1, 0).reshape(K, OC)          # (ki,kj,c) x OC
        wp = jnp.zeros((Kp, OCp), jnp.float32).at[:K, :OC].set(wm).astype(jnp.bfloat16)
        bp = jnp.zeros((1, OCp), jnp.float32).at[0, :OC].set(b)
        return wp, bp

    def fc1_slabs(w, b):
        OUT, IN = w.shape
        c, hh, ww = fc1_chw
        # Reorder the input dim from PyTorch's NCHW flatten (c,h,w) to our
        # NHWC flatten (h,w,c) so activations never transpose back to NCHW.
        wm = w.reshape(OUT, c, hh, ww).transpose(0, 2, 3, 1).reshape(OUT, IN).T
        INp, OUTp = _round_up(IN, 128), _round_up(OUT, 128)
        wp = jnp.zeros((INp, OUTp), jnp.float32).at[:IN, :OUT].set(wm).astype(jnp.bfloat16)
        bp = jnp.zeros((1, OUTp), jnp.float32).at[0, :OUT].set(b)
        return wp, bp

    def fc_slabs(w, b):
        OUT, IN = w.shape
        INp, OUTp = _round_up(IN, 128), _round_up(OUT, 128)
        wp = jnp.zeros((INp, OUTp), jnp.float32).at[:IN, :OUT].set(w.T).astype(jnp.bfloat16)
        bp = jnp.zeros((1, OUTp), jnp.float32).at[0, :OUT].set(b)
        return wp, bp

    q = {}
    q["conv1_w"], q["conv1_b"] = conv_slabs(p["conv1_w"], p["conv1_b"])
    q["conv2_w"], q["conv2_b"] = conv_slabs(p["conv2_w"], p["conv2_b"])
    q["fc1_w"], q["fc1_b"] = fc1_slabs(p["fc1_w"], p["fc1_b"])
    q["fc2_w"], q["fc2_b"] = fc_slabs(p["fc2_w"], p["fc2_b"])
    return q


def parameter_server_forward(prepped, x, *, oc1, oc2, num_classes):
    """ParameterServer.forward: out = self.model(x);  x is NCHW float32."""
    h = x.transpose(0, 2, 3, 1)                       # NCHW -> NHWC once
    h = conv3x3_relu_pool(h, prepped["conv1_w"], prepped["conv1_b"], oc1)
    h = conv3x3_relu_pool(h, prepped["conv2_w"], prepped["conv2_b"], oc2)
    h = h.reshape(h.shape[0], -1)                     # NHWC flatten (fc1 weights pre-permuted)
    return fc_head(h, prepped["fc1_w"], prepped["fc1_b"],
                   prepped["fc2_w"], prepped["fc2_b"], num_classes)


def reference_forward(params, x):
    """Pure-JAX f32 reference for correctness checking."""
    def conv(x, w, b):
        y = jax.lax.conv_general_dilated(
            x, w, (1, 1), "SAME",
            dimension_numbers=("NCHW", "OIHW", "NCHW"),
            precision=jax.lax.Precision.HIGHEST)
        return jax.nn.relu(y + b[None, :, None, None])

    def pool(x):
        return jax.lax.reduce_window(x, -jnp.inf, jax.lax.max,
                                     (1, 1, 2, 2), (1, 1, 2, 2), "VALID")

    h = pool(conv(x, params["conv1_w"], params["conv1_b"]))
    h = pool(conv(h, params["conv2_w"], params["conv2_b"]))
    h = h.reshape(h.shape[0], -1)
    h = jax.nn.relu(jnp.dot(h, params["fc1_w"].T,
                            precision=jax.lax.Precision.HIGHEST) + params["fc1_b"])
    return jnp.dot(h, params["fc2_w"].T,
                   precision=jax.lax.Precision.HIGHEST) + params["fc2_b"]


if __name__ == "__main__":
    key = jax.random.PRNGKey(0)
    kp, kx = jax.random.split(key)
    params = init_params(kp)
    x = jax.random.normal(kx, (2, 4, 16, 16), jnp.float32)   # NCHW

    prepped = prepare_params(params, fc1_chw=(params["conv2_w"].shape[0], 4, 4))
    fwd = jax.jit(functools.partial(
        parameter_server_forward,
        oc1=params["conv1_w"].shape[0],
        oc2=params["conv2_w"].shape[0],
        num_classes=params["fc2_w"].shape[0]))

    out = jax.block_until_ready(fwd(prepped, x))

    ref = reference_forward(params, x)
    assert out.shape == (2, 10), out.shape
    # bf16 MXU operands vs. f32 HIGHEST reference: expected max error ~1e-3 at
    # logit scale ~1e-1; 1e-2 tolerance still catches any structural bug.
    err = float(jnp.max(jnp.abs(out - ref)))
    assert jnp.allclose(out, ref, rtol=1e-2, atol=1e-2), err

    print("KERNEL_OK")
</pallas_src>

<mosaic_0001>
module attributes {stable_mosaic.version = 11 : i64} {
  func.func @_conv_pool_kernel(%arg0: i32, %arg1: memref<64x128xbf16, #tpu.memory_space<vmem>>, %arg2: memref<64x128xbf16, #tpu.memory_space<vmem>>, %arg3: memref<64x128xbf16, #tpu.memory_space<vmem>>, %arg4: memref<64x128xbf16, #tpu.memory_space<vmem>>, %arg5: memref<128x128xbf16, #tpu.memory_space<vmem>>, %arg6: memref<1x128xf32, #tpu.memory_space<vmem>>, %arg7: memref<64x128xf32, #tpu.memory_space<vmem>>) attributes {dimension_semantics = [#tpu.dimension_semantics<parallel>], iteration_bounds = array<i64: 2>, scalar_prefetch = 0 : i64, scratch_operands = 0 : i64, tpu.core_type = #tpu.core_type<tc>, window_params = [{transform_indices = @transform_0, window_bounds = array<i64: 64, 128>}, {transform_indices = @transform_1, window_bounds = array<i64: 64, 128>}, {transform_indices = @transform_2, window_bounds = array<i64: 64, 128>}, {transform_indices = @transform_3, window_bounds = array<i64: 64, 128>}, {pipeline_mode = #tpu.pipeline_mode<synchronous>, transform_indices = @transform_4, window_bounds = array<i64: 128, 128>}, {pipeline_mode = #tpu.pipeline_mode<synchronous>, transform_indices = @transform_5, window_bounds = array<i64: 1, 128>}, {transform_indices = @transform_6, window_bounds = array<i64: 64, 128>}]} {
    %c0 = arith.constant 0 : index
    %c0_0 = arith.constant 0 : index
    %0 = vector.load %arg5[%c0, %c0_0] : memref<128x128xbf16, #tpu.memory_space<vmem>>, vector<128x128xbf16>
    %c0_1 = arith.constant 0 : index
    %c0_2 = arith.constant 0 : index
    %1 = vector.load %arg1[%c0_1, %c0_2] : memref<64x128xbf16, #tpu.memory_space<vmem>>, vector<64x128xbf16>
    %cst = arith.constant dense<0.000000e+00> : vector<64x128xf32>
    %2 = tpu.matmul %1, %0, %cst {dimension_numbers = #tpu.dot_dimension_numbers<[1], [0], [0], [1], [0, 0, 1, 1], [], []>} : vector<64x128xbf16>, vector<128x128xbf16>, vector<64x128xf32> -> vector<64x128xf32>
    %c0_3 = arith.constant 0 : index
    %c0_4 = arith.constant 0 : index
    %3 = vector.load %arg2[%c0_3, %c0_4] : memref<64x128xbf16, #tpu.memory_space<vmem>>, vector<64x128xbf16>
    %cst_5 = arith.constant dense<0.000000e+00> : vector<64x128xf32>
    %4 = tpu.matmul %3, %0, %cst_5 {dimension_numbers = #tpu.dot_dimension_numbers<[1], [0], [0], [1], [0, 0, 1, 1], [], []>} : vector<64x128xbf16>, vector<128x128xbf16>, vector<64x128xf32> -> vector<64x128xf32>
    %c0_6 = arith.constant 0 : index
    %c0_7 = arith.constant 0 : index
    %5 = vector.load %arg3[%c0_6, %c0_7] : memref<64x128xbf16, #tpu.memory_space<vmem>>, vector<64x128xbf16>
    %cst_8 = arith.constant dense<0.000000e+00> : vector<64x128xf32>
    %6 = tpu.matmul %5, %0, %cst_8 {dimension_numbers = #tpu.dot_dimension_numbers<[1], [0], [0], [1], [0, 0, 1, 1], [], []>} : vector<64x128xbf16>, vector<128x128xbf16>, vector<64x128xf32> -> vector<64x128xf32>
    %c0_9 = arith.constant 0 : index
    %c0_10 = arith.constant 0 : index
    %7 = vector.load %arg4[%c0_9, %c0_10] : memref<64x128xbf16, #tpu.memory_space<vmem>>, vector<64x128xbf16>
    %cst_11 = arith.constant dense<0.000000e+00> : vector<64x128xf32>
    %8 = tpu.matmul %7, %0, %cst_11 {dimension_numbers = #tpu.dot_dimension_numbers<[1], [0], [0], [1], [0, 0, 1, 1], [], []>} : vector<64x128xbf16>, vector<128x128xbf16>, vector<64x128xf32> -> vector<64x128xf32>
    %9 = arith.maximumf %2, %4 : vector<64x128xf32>
    %10 = arith.maximumf %6, %8 : vector<64x128xf32>
    %11 = arith.maximumf %9, %10 : vector<64x128xf32>
    %c0_12 = arith.constant 0 : index
    %c0_13 = arith.constant 0 : index
    %12 = vector.load %arg6[%c0_12, %c0_13] : memref<1x128xf32, #tpu.memory_space<vmem>>, vector<1x128xf32>
    %13 = vector.broadcast %12 : vector<1x128xf32> to vector<64x128xf32>
    %14 = arith.addf %11, %13 : vector<64x128xf32>
    %cst_14 = arith.constant 0.000000e+00 : f32
    %15 = vector.broadcast %cst_14 : f32 to vector<64x128xf32>
    %16 = arith.maximumf %14, %15 : vector<64x128xf32>
    %c0_15 = arith.constant 0 : index
    %c0_16 = arith.constant 0 : index
    %17 = vector.load %arg7[%c0_15, %c0_16] : memref<64x128xf32, #tpu.memory_space<vmem>>, vector<64x128xf32>
    tpu.vector_store %arg7[%c0_15, %c0_16], %16 {strides = array<i32>} : memref<64x128xf32, #tpu.memory_space<vmem>>, vector<64x128xf32>,
    return
  }
  func.func @transform_0(%arg0: i32) -> (i32, i32) {
    %c0_i32 = arith.constant 0 : i32
    %c0_i32_0 = arith.constant 0 : i32
    return %arg0, %c0_i32 : i32, i32
  }
  func.func @transform_1(%arg0: i32) -> (i32, i32) {
    %c0_i32 = arith.constant 0 : i32
    %c0_i32_0 = arith.constant 0 : i32
    return %arg0, %c0_i32 : i32, i32
  }
  func.func @transform_2(%arg0: i32) -> (i32, i32) {
    %c0_i32 = arith.constant 0 : i32
    %c0_i32_0 = arith.constant 0 : i32
    return %arg0, %c0_i32 : i32, i32
  }
  func.func @transform_3(%arg0: i32) -> (i32, i32) {
    %c0_i32 = arith.constant 0 : i32
    %c0_i32_0 = arith.constant 0 : i32
    return %arg0, %c0_i32 : i32, i32
  }
  func.func @transform_4(%arg0: i32) -> (i32, i32) {
    %c0_i32 = arith.constant 0 : i32
    %c0_i32_0 = arith.constant 0 : i32
    %c0_i32_1 = arith.constant 0 : i32
    return %c0_i32, %c0_i32_0 : i32, i32
  }
  func.func @transform_5(%arg0: i32) -> (i32, i32) {
    %c0_i32 = arith.constant 0 : i32
    %c0_i32_0 = arith.constant 0 : i32
    %c0_i32_1 = arith.constant 0 : i32
    return %c0_i32, %c0_i32_0 : i32, i32
  }
  func.func @transform_6(%arg0: i32) -> (i32, i32) {
    %c0_i32 = arith.constant 0 : i32
    %c0_i32_0 = arith.constant 0 : i32
    return %arg0, %c0_i32 : i32, i32
  }
}

module attributes {stable_mosaic.version = 11 : i64} {
  func.func @_conv_pool_kernel(%arg0: i32, %arg1: memref<16x128xbf16, #tpu.memory_space<vmem>>, %arg2: memref<16x128xbf16, #tpu.memory_space<vmem>>, %arg3: memref<16x128xbf16, #tpu.memory_space<vmem>>, %arg4: memref<16x128xbf16, #tpu.memory_space<vmem>>, %arg5: memref<128x128xbf16, #tpu.memory_space<vmem>>, %arg6: memref<1x128xf32, #tpu.memory_space<vmem>>, %arg7: memref<16x128xf32, #tpu.memory_space<vmem>>) attributes {dimension_semantics = [#tpu.dimension_semantics<parallel>], iteration_bounds = array<i64: 2>, scalar_prefetch = 0 : i64, scratch_operands = 0 : i64, tpu.core_type = #tpu.core_type<tc>, window_params = [{transform_indices = @transform_0, window_bounds = array<i64: 16, 128>}, {transform_indices = @transform_1, window_bounds = array<i64: 16, 128>}, {transform_indices = @transform_2, window_bounds = array<i64: 16, 128>}, {transform_indices = @transform_3, window_bounds = array<i64: 16, 128>}, {pipeline_mode = #tpu.pipeline_mode<synchronous>, transform_indices = @transform_4, window_bounds = array<i64: 128, 128>}, {pipeline_mode = #tpu.pipeline_mode<synchronous>, transform_indices = @transform_5, window_bounds = array<i64: 1, 128>}, {transform_indices = @transform_6, window_bounds = array<i64: 16, 128>}]} {
    %c0 = arith.constant 0 : index
    %c0_0 = arith.constant 0 : index
    %0 = vector.load %arg5[%c0, %c0_0] : memref<128x128xbf16, #tpu.memory_space<vmem>>, vector<128x128xbf16>
    %c0_1 = arith.constant 0 : index
    %c0_2 = arith.constant 0 : index
    %1 = vector.load %arg1[%c0_1, %c0_2] : memref<16x128xbf16, #tpu.memory_space<vmem>>, vector<16x128xbf16>
    %cst = arith.constant dense<0.000000e+00> : vector<16x128xf32>
    %2 = tpu.matmul %1, %0, %cst {dimension_numbers = #tpu.dot_dimension_numbers<[1], [0], [0], [1], [0, 0, 1, 1], [], []>} : vector<16x128xbf16>, vector<128x128xbf16>, vector<16x128xf32> -> vector<16x128xf32>
    %c0_3 = arith.constant 0 : index
    %c0_4 = arith.constant 0 : index
    %3 = vector.load %arg2[%c0_3, %c0_4] : memref<16x128xbf16, #tpu.memory_space<vmem>>, vector<16x128xbf16>
    %cst_5 = arith.constant dense<0.000000e+00> : vector<16x128xf32>
    %4 = tpu.matmul %3, %0, %cst_5 {dimension_numbers = #tpu.dot_dimension_numbers<[1], [0], [0], [1], [0, 0, 1, 1], [], []>} : vector<16x128xbf16>, vector<128x128xbf16>, vector<16x128xf32> -> vector<16x128xf32>
    %c0_6 = arith.constant 0 : index
    %c0_7 = arith.constant 0 : index
    %5 = vector.load %arg3[%c0_6, %c0_7] : memref<16x128xbf16, #tpu.memory_space<vmem>>, vector<16x128xbf16>
    %cst_8 = arith.constant dense<0.000000e+00> : vector<16x128xf32>
    %6 = tpu.matmul %5, %0, %cst_8 {dimension_numbers = #tpu.dot_dimension_numbers<[1], [0], [0], [1], [0, 0, 1, 1], [], []>} : vector<16x128xbf16>, vector<128x128xbf16>, vector<16x128xf32> -> vector<16x128xf32>
    %c0_9 = arith.constant 0 : index
    %c0_10 = arith.constant 0 : index
    %7 = vector.load %arg4[%c0_9, %c0_10] : memref<16x128xbf16, #tpu.memory_space<vmem>>, vector<16x128xbf16>
    %cst_11 = arith.constant dense<0.000000e+00> : vector<16x128xf32>
    %8 = tpu.matmul %7, %0, %cst_11 {dimension_numbers = #tpu.dot_dimension_numbers<[1], [0], [0], [1], [0, 0, 1, 1], [], []>} : vector<16x128xbf16>, vector<128x128xbf16>, vector<16x128xf32> -> vector<16x128xf32>
    %9 = arith.maximumf %2, %4 : vector<16x128xf32>
    %10 = arith.maximumf %6, %8 : vector<16x128xf32>
    %11 = arith.maximumf %9, %10 : vector<16x128xf32>
    %c0_12 = arith.constant 0 : index
    %c0_13 = arith.constant 0 : index
    %12 = vector.load %arg6[%c0_12, %c0_13] : memref<1x128xf32, #tpu.memory_space<vmem>>, vector<1x128xf32>
    %13 = vector.broadcast %12 : vector<1x128xf32> to vector<16x128xf32>
    %14 = arith.addf %11, %13 : vector<16x128xf32>
    %cst_14 = arith.constant 0.000000e+00 : f32
    %15 = vector.broadcast %cst_14 : f32 to vector<16x128xf32>
    %16 = arith.maximumf %14, %15 : vector<16x128xf32>
    %c0_15 = arith.constant 0 : index
    %c0_16 = arith.constant 0 : index
    %17 = vector.load %arg7[%c0_15, %c0_16] : memref<16x128xf32, #tpu.memory_space<vmem>>, vector<16x128xf32>
    tpu.vector_store %arg7[%c0_15, %c0_16], %16 {strides = array<i32>} : memref<16x128xf32, #tpu.memory_space<vmem>>, vector<16x128xf32>,
    return
  }
  func.func @transform_0(%arg0: i32) -> (i32, i32) {
    %c0_i32 = arith.constant 0 : i32
    %c0_i32_0 = arith.constant 0 : i32
    return %arg0, %c0_i32 : i32, i32
  }
  func.func @transform_1(%arg0: i32) -> (i32, i32) {
    %c0_i32 = arith.constant 0 : i32
    %c0_i32_0 = arith.constant 0 : i32
    return %arg0, %c0_i32 : i32, i32
  }
  func.func @transform_2(%arg0: i32) -> (i32, i32) {
    %c0_i32 = arith.constant 0 : i32
    %c0_i32_0 = arith.constant 0 : i32
    return %arg0, %c0_i32 : i32, i32
  }
  func.func @transform_3(%arg0: i32) -> (i32, i32) {
    %c0_i32 = arith.constant 0 : i32
    %c0_i32_0 = arith.constant 0 : i32
    return %arg0, %c0_i32 : i32, i32
  }
  func.func @transform_4(%arg0: i32) -> (i32, i32) {
    %c0_i32 = arith.constant 0 : i32
    %c0_i32_0 = arith.constant 0 : i32
    %c0_i32_1 = arith.constant 0 : i32
    return %c0_i32, %c0_i32_0 : i32, i32
  }
  func.func @transform_5(%arg0: i32) -> (i32, i32) {
    %c0_i32 = arith.constant 0 : i32
    %c0_i32_0 = arith.constant 0 : i32
    %c0_i32_1 = arith.constant 0 : i32
    return %c0_i32, %c0_i32_0 : i32, i32
  }
  func.func @transform_6(%arg0: i32) -> (i32, i32) {
    %c0_i32 = arith.constant 0 : i32
    %c0_i32_0 = arith.constant 0 : i32
    return %arg0, %c0_i32 : i32, i32
  }
}

module attributes {stable_mosaic.version = 11 : i64} {
  func.func @_fc_fused_kernel(%arg0: i32, %arg1: memref<8x256xbf16, #tpu.memory_space<vmem>>, %arg2: memref<256x128xbf16, #tpu.memory_space<vmem>>, %arg3: memref<1x128xf32, #tpu.memory_space<vmem>>, %arg4: memref<128x128xbf16, #tpu.memory_space<vmem>>, %arg5: memref<1x128xf32, #tpu.memory_space<vmem>>, %arg6: memref<8x128xf32, #tpu.memory_space<vmem>>) attributes {dimension_semantics = [#tpu.dimension_semantics<arbitrary>], iteration_bounds = array<i64: 1>, scalar_prefetch = 0 : i64, scratch_operands = 0 : i64, tpu.core_type = #tpu.core_type<tc>, window_params = [{pipeline_mode = #tpu.pipeline_mode<synchronous>, transform_indices = @transform_0, window_bounds = array<i64: 8, 256>}, {pipeline_mode = #tpu.pipeline_mode<synchronous>, transform_indices = @transform_1, window_bounds = array<i64: 256, 128>}, {pipeline_mode = #tpu.pipeline_mode<synchronous>, transform_indices = @transform_2, window_bounds = array<i64: 1, 128>}, {pipeline_mode = #tpu.pipeline_mode<synchronous>, transform_indices = @transform_3, window_bounds = array<i64: 128, 128>}, {pipeline_mode = #tpu.pipeline_mode<synchronous>, transform_indices = @transform_4, window_bounds = array<i64: 1, 128>}, {pipeline_mode = #tpu.pipeline_mode<synchronous>, transform_indices = @transform_5, window_bounds = array<i64: 8, 128>}]} {
    %c0 = arith.constant 0 : index
    %c0_0 = arith.constant 0 : index
    %0 = vector.load %arg1[%c0, %c0_0] : memref<8x256xbf16, #tpu.memory_space<vmem>>, vector<8x256xbf16>
    %c0_1 = arith.constant 0 : index
    %c0_2 = arith.constant 0 : index
    %1 = vector.load %arg2[%c0_1, %c0_2] : memref<256x128xbf16, #tpu.memory_space<vmem>>, vector<256x128xbf16>
    %cst = arith.constant dense<0.000000e+00> : vector<8x128xf32>
    %2 = tpu.matmul %0, %1, %cst {dimension_numbers = #tpu.dot_dimension_numbers<[1], [0], [0], [1], [0, 0, 1, 1], [], []>} : vector<8x256xbf16>, vector<256x128xbf16>, vector<8x128xf32> -> vector<8x128xf32>
    %c0_3 = arith.constant 0 : index
    %c0_4 = arith.constant 0 : index
    %3 = vector.load %arg3[%c0_3, %c0_4] : memref<1x128xf32, #tpu.memory_space<vmem>>, vector<1x128xf32>
    %4 = vector.broadcast %3 : vector<1x128xf32> to vector<8x128xf32>
    %5 = arith.addf %2, %4 : vector<8x128xf32>
    %cst_5 = arith.constant 0.000000e+00 : f32
    %6 = vector.broadcast %cst_5 : f32 to vector<8x128xf32>
    %7 = arith.maximumf %5, %6 : vector<8x128xf32>
    %8 = arith.truncf %7 : vector<8x128xf32> to vector<8x128xbf16>
    %c0_6 = arith.constant 0 : index
    %c0_7 = arith.constant 0 : index
    %9 = vector.load %arg4[%c0_6, %c0_7] : memref<128x128xbf16, #tpu.memory_space<vmem>>, vector<128x128xbf16>
    %cst_8 = arith.constant dense<0.000000e+00> : vector<8x128xf32>
    %10 = tpu.matmul %8, %9, %cst_8 {dimension_numbers = #tpu.dot_dimension_numbers<[1], [0], [0], [1], [0, 0, 1, 1], [], []>} : vector<8x128xbf16>, vector<128x128xbf16>, vector<8x128xf32> -> vector<8x128xf32>
    %c0_9 = arith.constant 0 : index
    %c0_10 = arith.constant 0 : index
    %11 = vector.load %arg5[%c0_9, %c0_10] : memref<1x128xf32, #tpu.memory_space<vmem>>, vector<1x128xf32>
    %12 = vector.broadcast %11 : vector<1x128xf32> to vector<8x128xf32>
    %13 = arith.addf %10, %12 : vector<8x128xf32>
    %c0_11 = arith.constant 0 : index
    %c0_12 = arith.constant 0 : index
    %14 = vector.load %arg6[%c0_11, %c0_12] : memref<8x128xf32, #tpu.memory_space<vmem>>, vector<8x128xf32>
    tpu.vector_store %arg6[%c0_11, %c0_12], %13 {strides = array<i32>} : memref<8x128xf32, #tpu.memory_space<vmem>>, vector<8x128xf32>,
    return
  }
  func.func @transform_0(%arg0: i32) -> (i32, i32) {
    %c0_i32 = arith.constant 0 : i32
    %c0_i32_0 = arith.constant 0 : i32
    %c0_i32_1 = arith.constant 0 : i32
    return %c0_i32, %c0_i32_0 : i32, i32
  }
  func.func @transform_1(%arg0: i32) -> (i32, i32) {
    %c0_i32 = arith.constant 0 : i32
    %c0_i32_0 = arith.constant 0 : i32
    %c0_i32_1 = arith.constant 0 : i32
    return %c0_i32, %c0_i32_0 : i32, i32
  }
  func.func @transform_2(%arg0: i32) -> (i32, i32) {
    %c0_i32 = arith.constant 0 : i32
    %c0_i32_0 = arith.constant 0 : i32
    %c0_i32_1 = arith.constant 0 : i32
    return %c0_i32, %c0_i32_0 : i32, i32
  }
  func.func @transform_3(%arg0: i32) -> (i32, i32) {
    %c0_i32 = arith.constant 0 : i32
    %c0_i32_0 = arith.constant 0 : i32
    %c0_i32_1 = arith.constant 0 : i32
    return %c0_i32, %c0_i32_0 : i32, i32
  }
  func.func @transform_4(%arg0: i32) -> (i32, i32) {
    %c0_i32 = arith.constant 0 : i32
    %c0_i32_0 = arith.constant 0 : i32
    %c0_i32_1 = arith.constant 0 : i32
    return %c0_i32, %c0_i32_0 : i32, i32
  }
  func.func @transform_5(%arg0: i32) -> (i32, i32) {
    %c0_i32 = arith.constant 0 : i32
    %c0_i32_0 = arith.constant 0 : i32
    %c0_i32_1 = arith.constant 0 : i32
    return %c0_i32, %c0_i32_0 : i32, i32
  }
}

</mosaic_0001>

<bundles_post_ra>
// kernel: parameter_server_forward.3
= control target key start
LH: loop header
LB: loop body
LE: loop exit
PB: predicated region body
PF: predicated region fallthrough
CT: control target
= control target key end

     0   :  { %s1182_s21 = smov 0   ;;  %s1303_s0 = inlined_call_operand.vmem [shape: bf16[128,128], index: 0, kind: input, shape index: {}]   ;;  %s1304_s1 = inlined_call_operand.vmem [shape: bf16[128,128], index: 1, kind: input, shape index: {}]   ;;  %s1305_s2 = inlined_call_operand.vmem [shape: bf16[128,128], index: 2, kind: input, shape index: {}]   ;;  %s1306_s3 = inlined_call_operand.vmem [shape: bf16[128,128], index: 3, kind: input, shape index: {}]   ;;  %s1307_s4 = inlined_call_operand.vmem [shape: bf16[128,128], index: 4, kind: input, shape index: {}]   ;;  %s1308_s5 = inlined_call_operand.vmem [shape: f32[1,128], index: 5, kind: input, shape index: {}]   ;;  %s1309_s6 = inlined_call_operand.vmem [shape: f32[128,128], index: 6, kind: output, shape index: {}]  }
   0x1 LB: > { %s921_s22 = sadd.s32 4294967295, %s1145_s21   ;;  %p925_p0 = scmp.ge.s32.totalorder %s1145_s21, 1  ;;  %s1145_s21 = sphi %s1182_s21, %s16_s21  }
   0x2   : > { %p246_p1 = scmp.lt.s32.totalorder %s1145_s21, 3 }
   0x4   : > { %p247_p2 = pnand %p925_p0, %p246_p1 }
   0x5   : > { %v1115_v0 = vld [vmem:[%s1307_s4] sm:$0xff] (!%p247_p2)   ;;  %s926_s25 = sshll.u32 (!%p247_p2), %s921_s22, 3  ;;  %v1196_v1 = vld [vmem:[%s1307_s4 + $0x8] sm:$0xff] (!%p247_p2)   ;;  %v1205_v2 = vld [vmem:[%s1307_s4 + $0x10] sm:$0xff] (!%p247_p2)  }
   0x6   : > { %250 = sbr.rel (%p247_p2) target bundleno = 302 (0x12e), region = 44  ;;  %p292_p3 = scmp.lt.s32.totalorder (!%p247_p2), %s926_s25, 15  ;;  %1011 = vmatprep.subr.bf16.mxu0 (!%p247_p2), %v1115_v0  ;;  %1035 = vmatprep.subr.bf16.mxu1 (!%p247_p2), %v1115_v0  ;;  %v1223_v3 = vld [vmem:[%s1307_s4 + $0x18] sm:$0xff] (!%p247_p2)   ;;  %v1119_v6 = vld [vmem:[%s1307_s4 + $0x20] sm:$0xff] (!%p247_p2)   ;;  %v1120_v7 = vld [vmem:[%s1307_s4 + $0x28] sm:$0xff] (!%p247_p2)  }
   0x7   : > { %1012 = vmatpush3.bf16.msra.mxu0 (!%p247_p2), %v1115_v0  ;;  %1036 = vmatpush3.bf16.msra.mxu1 (!%p247_p2), %v1115_v0  ;;  %v1121_v8 = vld [vmem:[%s1307_s4 + $0x30] sm:$0xff] (!%p247_p2)   ;;  %v1122_v9 = vld [vmem:[%s1307_s4 + $0x38] sm:$0xff] (!%p247_p2)   ;;  %v960_v53 = vld [vmem:[%s1308_s5] ss:$0 sm:$0xff] (!%p247_p2) }
   0x8   : > { %1013 = vmatprep.subr.bf16.mxu0 (!%p247_p2), %v1196_v1  ;;  %1037 = vmatprep.subr.bf16.mxu1 (!%p247_p2), %v1196_v1 }
   0xb   : > { %1014 = vmatpush3.bf16.msra.mxu0 (!%p247_p2), %v1196_v1  ;;  %1038 = vmatpush3.bf16.msra.mxu1 (!%p247_p2), %v1196_v1 }
   0xc   : > { %1015 = vmatprep.subr.bf16.mxu0 (!%p247_p2), %v1205_v2  ;;  %1039 = vmatprep.subr.bf16.mxu1 (!%p247_p2), %v1205_v2 }
   0xd   : > { %s1311_s25 = smov (!%p292_p3, %s926_s25), 15 }
   0xe   : > { %s927_s30 = sshll.u32 %s1311_s25, 2 }
   0xf   : > { %s1211_s9 = scalar_lea.vmem %s1303_s0, %s927_s30  ;;  %s1216_s12 = scalar_lea.vmem %s1304_s1, %s927_s30  ;;  %1016 = vmatpush3.bf16.msra.mxu0 %v1205_v2  ;;  %1040 = vmatpush3.bf16.msra.mxu1 %v1205_v2 }
  0x10   : > { %v1123_v4 = vld [vmem:[%s1211_s9] sm:$0xff]   ;;  %1017 = vmatprep.subr.bf16.mxu0 %v1223_v3  ;;  %1041 = vmatprep.subr.bf16.mxu1 %v1223_v3  ;;  %s1241_s19 = scalar_lea.vmem %s1305_s2, %s927_s30  ;;  %s1249_s26 = scalar_lea.vmem %s1306_s3, %s927_s30  ;;  %v1125_v10 = vld [vmem:[%s1211_s9 + $0x8] sm:$0xff]   ;;  %v1127_v12 = vld [vmem:[%s1211_s9 + $0x10] sm:$0xff]  }
  0x11   : > { %v1124_v5 = vld [vmem:[%s1216_s12] sm:$0xff]   ;;  %1027 = vmatprep.mubr.bf16.mxu0 %v1123_v4  ;;  %v1126_v11 = vld [vmem:[%s1216_s12 + $0x8] sm:$0xff]   ;;  %v1128_v13 = vld [vmem:[%s1216_s12 + $0x10] sm:$0xff]  }
  0x12   : > { %1051 = vmatprep.mubr.bf16.mxu1 %v1124_v5  ;;  %v1129_v14 = vld [vmem:[%s1211_s9 + $0x18] sm:$0xff]   ;;  %v1131_v16 = vld [vmem:[%s1241_s19] sm:$0xff]   ;;  %v1133_v18 = vld [vmem:[%s1241_s19 + $0x8] sm:$0xff]   ;;  %s935_s9 = sshll.u32 %s1311_s25, 3 }
  0x13   : > { %1018 = vmatpush3.bf16.msra.mxu0 %v1223_v3  ;;  %1042 = vmatpush3.bf16.msra.mxu1 %v1223_v3  ;;  %v1130_v15 = vld [vmem:[%s1216_s12 + $0x18] sm:$0xff]   ;;  %v1132_v17 = vld [vmem:[%s1249_s26] sm:$0xff]   ;;  %v1134_v19 = vld [vmem:[%s1249_s26 + $0x8] sm:$0xff]   ;;  %s1290_s12 = scalar_lea.vmem %s1309_s6, %s935_s9 }
  0x14   : > { %1019 = vmatprep.subr.bf16.mxu0 %v1119_v6  ;;  %1043 = vmatprep.subr.bf16.mxu1 %v1119_v6  ;;  %v1135_v20 = vld [vmem:[%s1241_s19 + $0x10] sm:$0xff]   ;;  %v1137_v22 = vld [vmem:[%s1241_s19 + $0x18] sm:$0xff]  }
  0x15   : > { %v1136_v21 = vld [vmem:[%s1249_s26 + $0x10] sm:$0xff]   ;;  %v1138_v23 = vld [vmem:[%s1249_s26 + $0x18] sm:$0xff]  }
  0x17   : > { %1020 = vmatpush3.bf16.msra.mxu0 %v1119_v6  ;;  %1044 = vmatpush3.bf16.msra.mxu1 %v1119_v6 }
  0x18   : > { %1021 = vmatprep.subr.bf16.mxu0 %v1120_v7  ;;  %1045 = vmatprep.subr.bf16.mxu1 %v1120_v7 }
  0x1b   : > { %1022 = vmatpush3.bf16.msra.mxu0 %v1120_v7  ;;  %1046 = vmatpush3.bf16.msra.mxu1 %v1120_v7 }
  0x1c   : > { %1023 = vmatprep.subr.bf16.mxu0 %v1121_v8  ;;  %1047 = vmatprep.subr.bf16.mxu1 %v1121_v8 }
  0x1f   : > { %1024 = vmatpush3.bf16.msra.mxu0 %v1121_v8  ;;  %1048 = vmatpush3.bf16.msra.mxu1 %v1121_v8 }
  0x20   : > { %1025 = vmatprep.subr.bf16.mxu0 %v1122_v9  ;;  %1049 = vmatprep.subr.bf16.mxu1 %v1122_v9 }
  0x23   : > { %1026 = vmatpush3.bf16.msra.mxu0 %v1122_v9  ;;  %1050 = vmatpush3.bf16.msra.mxu1 %v1122_v9 }
  0x24   : > { %1059 = vmatprep.subr.bf16.mxu0 %v1115_v0  ;;  %1083 = vmatprep.subr.bf16.mxu1 %v1115_v0 }
  0x26   : > { %1028 = vmatmul.mubr.bf16.vlgmr.msra.gmra.mrb[0].mxu0 %v1125_v10  ;;  %1052 = vmatmul.mubr.bf16.vlgmr.msra.gmra.mrb[0].mxu1 %v1126_v11 }
  0x27   : > { %1060 = vmatpush3.bf16.msra.mxu0 %v1115_v0  ;;  %1084 = vmatpush3.bf16.msra.mxu1 %v1115_v0 }
  0x28   : > { %1061 = vmatprep.subr.bf16.mxu0 %v1196_v1  ;;  %1085 = vmatprep.subr.bf16.mxu1 %v1196_v1 }
  0x29   : > { %1031 = vmatprep.mubr.bf16.mxu0 %v1127_v12  ;;  %1055 = vmatprep.mubr.bf16.mxu1 %v1128_v13 }
  0x2b   : > { %1062 = vmatpush3.bf16.msra.mxu0 %v1196_v1  ;;  %1086 = vmatpush3.bf16.msra.mxu1 %v1196_v1 }
  0x2c   : > { %1063 = vmatprep.subr.bf16.mxu0 %v1205_v2  ;;  %1087 = vmatprep.subr.bf16.mxu1 %v1205_v2 }
  0x2e   : > { %1032 = vmatmul.mubr.bf16.gmra.mrb[4].mxu0 %v1129_v14  ;;  %1056 = vmatmul.mubr.bf16.gmra.mrb[4].mxu1 %v1130_v15 }
  0x2f   : > { %1064 = vmatpush3.bf16.msra.mxu0 %v1205_v2  ;;  %1088 = vmatpush3.bf16.msra.mxu1 %v1205_v2 }
  0x30   : > { %1065 = vmatprep.subr.bf16.mxu0 %v1223_v3  ;;  %1089 = vmatprep.subr.bf16.mxu1 %v1223_v3 }
  0x31   : > { %1075 = vmatprep.mubr.bf16.mxu0 %v1131_v16  ;;  %1099 = vmatprep.mubr.bf16.mxu1 %v1132_v17 }
  0x33   : > { %1066 = vmatpush3.bf16.msra.mxu0 %v1223_v3  ;;  %1090 = vmatpush3.bf16.msra.mxu1 %v1223_v3 }
  0x34   : > { %1067 = vmatprep.subr.bf16.mxu0 %v1119_v6  ;;  %1091 = vmatprep.subr.bf16.mxu1 %v1119_v6 }
  0x37   : > { %1068 = vmatpush3.bf16.msra.mxu0 %v1119_v6  ;;  %1092 = vmatpush3.bf16.msra.mxu1 %v1119_v6 }
  0x38   : > { %1069 = vmatprep.subr.bf16.mxu0 %v1120_v7  ;;  %1093 = vmatprep.subr.bf16.mxu1 %v1120_v7 }
  0x3b   : > { %1070 = vmatpush3.bf16.msra.mxu0 %v1120_v7  ;;  %1094 = vmatpush3.bf16.msra.mxu1 %v1120_v7 }
  0x3c   : > { %1071 = vmatprep.subr.bf16.mxu0 %v1121_v8  ;;  %1095 = vmatprep.subr.bf16.mxu1 %v1121_v8 }
  0x3f   : > { %1072 = vmatpush3.bf16.msra.mxu0 %v1121_v8  ;;  %1096 = vmatpush3.bf16.msra.mxu1 %v1121_v8 }
  0x40   : > { %1073 = vmatprep.subr.bf16.mxu0 %v1122_v9  ;;  %1097 = vmatprep.subr.bf16.mxu1 %v1122_v9 }
  0x43   : > { %1074 = vmatpush3.bf16.msra.mxu0 %v1122_v9  ;;  %1098 = vmatpush3.bf16.msra.mxu1 %v1122_v9 }
  0x46   : > { %1076 = vmatmul.mubr.bf16.vlgmr.msra.gmra.mrb[8].mxu0 %v1133_v18  ;;  %1100 = vmatmul.mubr.bf16.vlgmr.msra.gmra.mrb[8].mxu1 %v1134_v19 }
  0x47   : > { %1079 = vmatprep.mubr.bf16.mxu0 %v1135_v20  ;;  %1103 = vmatprep.mubr.bf16.mxu1 %v1136_v21 }
  0x4e   : > { %1080 = vmatmul.mubr.bf16.gmra.mrb[12].mxu0 %v1137_v22  ;;  %1104 = vmatmul.mubr.bf16.gmra.mrb[12].mxu1 %v1138_v23 }
  0xf9   : > { %v1029_v24 = vpop.f32.mrb[0].mxu0  ;;  %v1053_v25 = vpop.f32.mrb[0].mxu1 }
  0xfa   : > { %v776_v26 = vmax.f32 %v1029_v24, %v1053_v25  ;;  %v452_v27 = vpop.f32.mrb[1].mxu0  ;;  %v549_v28 = vpop.f32.mrb[1].mxu1 }
  0xfb   : > { %v774_v29 = vmax.f32 %v452_v27, %v549_v28  ;;  %v1030_v30 = vpop.f32.mrb[2].mxu0  ;;  %v1054_v31 = vpop.f32.mrb[2].mxu1 }
  0xfc   : > { %v777_v32 = vmax.f32 %v1030_v30, %v1054_v31  ;;  %v455_v33 = vpop.f32.mrb[3].mxu0  ;;  %v552_v34 = vpop.f32.mrb[3].mxu1 }
  0xfd   : > { %v775_v35 = vmax.f32 %v455_v33, %v552_v34 }
 0x101   : > { %v1033_v36 = vpop.f32.mrb[4].mxu0  ;;  %v1057_v37 = vpop.f32.mrb[4].mxu1 }
 0x102   : > { %v780_v38 = vmax.f32 %v1033_v36, %v1057_v37  ;;  %v468_v39 = vpop.f32.mrb[5].mxu0  ;;  %v565_v40 = vpop.f32.mrb[5].mxu1 }
 0x103   : > { %v778_v41 = vmax.f32 %v468_v39, %v565_v40  ;;  %v1034_v42 = vpop.f32.mrb[6].mxu0  ;;  %v1058_v43 = vpop.f32.mrb[6].mxu1 }
 0x104   : > { %v781_v44 = vmax.f32 %v1034_v42, %v1058_v43  ;;  %v471_v45 = vpop.f32.mrb[7].mxu0  ;;  %v568_v46 = vpop.f32.mrb[7].mxu1 }
 0x105   : > { %v779_v47 = vmax.f32 %v471_v45, %v568_v46 }
 0x119   : > { %v1077_v48 = vpop.f32.mrb[8].mxu0  ;;  %v1101_v49 = vpop.f32.mrb[8].mxu1 }
 0x11a   : > { %v784_v50 = vmax.f32 %v1077_v48, %v1101_v49  ;;  %v646_v51 = vpop.f32.mrb[9].mxu0  ;;  %v743_v52 = vpop.f32.mrb[9].mxu1 }
 0x11b   : > { %v782_v54 = vmax.f32 %v646_v51, %v743_v52  ;;  %v1078_v55 = vpop.f32.mrb[10].mxu0  ;;  %v1102_v56 = vpop.f32.mrb[10].mxu1 }
 0x11c   : > { %v792_v57 = vmax.f32 %v776_v26, %v784_v50  ;;  %v785_v58 = vmax.f32 %v1078_v55, %v1102_v56  ;;  %v649_v59 = vpop.f32.mrb[11].mxu0  ;;  %v746_v60 = vpop.f32.mrb[11].mxu1 }
 0x11d   : > { %v790_v61 = vmax.f32 %v774_v29, %v782_v54  ;;  %v783_v62 = vmax.f32 %v649_v59, %v746_v60 }
 0x11e   : > { %v807_v63 = vadd.f32 %v960_v53, %v792_v57  ;;  %v793_v0 = vmax.f32 %v777_v32, %v785_v58 }
 0x11f   : > { %v805_v1 = vadd.f32 %v960_v53, %v790_v61  ;;  %v791_v2 = vmax.f32 %v775_v35, %v783_v62 }
 0x120   : > { %v815_v3 = vmax.f32 %v807_v63, 0.0  ;;  %v808_v4 = vadd.f32 %v960_v53, %v793_v0 }
 0x121   : > { %v813_v5 = vmax.f32 %v805_v1, 0.0  ;;  %v806_v6 = vadd.f32 %v960_v53, %v791_v2  ;;  %v1081_v7 = vpop.f32.mrb[12].mxu0  ;;  %v1105_v8 = vpop.f32.mrb[12].mxu1 }
 0x122   : > { %823 = vst [vmem:[%s1290_s12 + $0x10] sm:$0xff] %v815_v3  ;;  %v816_v9 = vmax.f32 %v808_v4, 0.0  ;;  %v788_v10 = vmax.f32 %v1081_v7, %v1105_v8  ;;  %v662_v11 = vpop.f32.mrb[13].mxu0  ;;  %v759_v12 = vpop.f32.mrb[13].mxu1 }
 0x123   : > { %821 = vst [vmem:[%s1290_s12] sm:$0xff] %v813_v5  ;;  %v814_v13 = vmax.f32 %v806_v6, 0.0  ;;  %v786_v14 = vmax.f32 %v662_v11, %v759_v12  ;;  %v1082_v15 = vpop.f32.mrb[14].mxu0  ;;  %v1106_v16 = vpop.f32.mrb[14].mxu1 }
 0x124   : > { %824 = vst [vmem:[%s1290_s12 + $0x18] sm:$0xff] %v816_v9  ;;  %v796_v17 = vmax.f32 %v780_v38, %v788_v10  ;;  %v789_v18 = vmax.f32 %v1082_v15, %v1106_v16  ;;  %v665_v19 = vpop.f32.mrb[15].mxu0  ;;  %v762_v20 = vpop.f32.mrb[15].mxu1 }
 0x125   : > { %822 = vst [vmem:[%s1290_s12 + $0x8] sm:$0xff] %v814_v13  ;;  %v794_v21 = vmax.f32 %v778_v41, %v786_v14  ;;  %v787_v22 = vmax.f32 %v665_v19, %v762_v20 }
 0x126   : > { %v811_v23 = vadd.f32 %v960_v53, %v796_v17  ;;  %v797_v24 = vmax.f32 %v781_v44, %v789_v18 }
 0x127   : > { %v809_v25 = vadd.f32 %v960_v53, %v794_v21  ;;  %v795_v26 = vmax.f32 %v779_v47, %v787_v22 }
 0x128   : > { %v819_v27 = vmax.f32 %v811_v23, 0.0  ;;  %v812_v28 = vadd.f32 %v960_v53, %v797_v24 }
 0x129   : > { %v817_v29 = vmax.f32 %v809_v25, 0.0  ;;  %v810_v30 = vadd.f32 %v960_v53, %v795_v26 }
 0x12a   : > { %827 = vst [vmem:[%s1290_s12 + $0x30] sm:$0xff] %v819_v27  ;;  %v820_v31 = vmax.f32 %v812_v28, 0.0 }
 0x12b   : > { %825 = vst [vmem:[%s1290_s12 + $0x20] sm:$0xff] %v817_v29  ;;  %v818_v32 = vmax.f32 %v810_v30, 0.0 }
 0x12c   : > { %828 = vst [vmem:[%s1290_s12 + $0x38] sm:$0xff] %v820_v31 }
 0x12d   : > { %826 = vst [vmem:[%s1290_s12 + $0x28] sm:$0xff] %v818_v32 }
 0x12e PF: > { %s16_s21 = sadd.s32 1, %s1145_s21  }
 0x12f   : > { %p13_p4 = scmp.ge.s32.totalorder %s16_s21, 4  }
 0x131   :  { %15 = sbr.rel (!%p13_p4) target bundleno = 1 (0x1), region = 83 }

// kernel: parameter_server_forward.4
= control target key start
LH: loop header
LB: loop body
LE: loop exit
PB: predicated region body
PF: predicated region fallthrough
CT: control target
= control target key end

     0   :  { %s906_s21 = smov 0   ;;  %s1019_s0 = inlined_call_operand.vmem [shape: bf16[32,128], index: 0, kind: input, shape index: {}]   ;;  %s1020_s1 = inlined_call_operand.vmem [shape: bf16[32,128], index: 1, kind: input, shape index: {}]   ;;  %s1021_s2 = inlined_call_operand.vmem [shape: bf16[32,128], index: 2, kind: input, shape index: {}]   ;;  %s1022_s3 = inlined_call_operand.vmem [shape: bf16[32,128], index: 3, kind: input, shape index: {}]   ;;  %s1023_s4 = inlined_call_operand.vmem [shape: bf16[128,128], index: 4, kind: input, shape index: {}]   ;;  %s1024_s5 = inlined_call_operand.vmem [shape: f32[1,128], index: 5, kind: input, shape index: {}]   ;;  %s1025_s6 = inlined_call_operand.vmem [shape: f32[32,128], index: 6, kind: output, shape index: {}]  }
   0x1 LB: > { %s693_s22 = sadd.s32 4294967295, %s867_s21   ;;  %p697_p0 = scmp.ge.s32.totalorder %s867_s21, 1  ;;  %s867_s21 = sphi %s906_s21, %s16_s21  }
   0x2   : > { %p246_p1 = scmp.lt.s32.totalorder %s867_s21, 3 }
   0x4   : > { %p247_p2 = pnand %p697_p0, %p246_p1 }
   0x5   : > { %v849_v0 = vld [vmem:[%s1023_s4] sm:$0xff] (!%p247_p2)   ;;  %v869_v1 = vmov (!%p247_p2), 0.0   ;;  %v850_v2 = vld [vmem:[%s1023_s4 + $0x8] sm:$0xff] (!%p247_p2)   ;;  %s698_s27 = sshll.u32 (!%p247_p2), %s693_s22, 1  ;;  %vm870_vm0 = vmmov (!%p247_p2), 0   ;;  %v851_v3 = vld [vmem:[%s1023_s4 + $0x10] sm:$0xff] (!%p247_p2)  }
   0x6   : > { %250 = sbr.rel (%p247_p2) target bundleno = 293 (0x125), region = 44  ;;  %759 = vmatprep.subr.bf16.mxu0 (!%p247_p2), %v869_v1  ;;  %779 = vmatprep.subr.bf16.mxu1 (!%p247_p2), %v869_v1  ;;  %p292_p3 = scmp.lt.s32.totalorder (!%p247_p2), %s698_s27, 3  ;;  %v852_v4 = vld [vmem:[%s1023_s4 + $0x18] sm:$0xff] (!%p247_p2)   ;;  %v853_v5 = vld [vmem:[%s1023_s4 + $0x20] sm:$0xff] (!%p247_p2)   ;;  %v854_v6 = vld [vmem:[%s1023_s4 + $0x28] sm:$0xff] (!%p247_p2)  }
   0x7   : > { %760 = vmatpush3.bf16.msra.mxu0 (!%p247_p2), %v849_v0  ;;  %780 = vmatpush3.bf16.msra.mxu1 (!%p247_p2), %v849_v0  ;;  %v855_v7 = vld [vmem:[%s1023_s4 + $0x30] sm:$0xff] (!%p247_p2)   ;;  %v856_v8 = vld [vmem:[%s1023_s4 + $0x38] sm:$0xff] (!%p247_p2)   ;;  %v720_v28 = vld [vmem:[%s1024_s5] ss:$0 sm:$0xff] (!%p247_p2) }
   0x8   : > { %761 = vmatprep.subr.bf16.mxu0 (!%p247_p2), %v869_v1  ;;  %781 = vmatprep.subr.bf16.mxu1 (!%p247_p2), %v869_v1 }
   0x9   : > { %775 = vmatprep.mubr.msk.bf16.mxu0 (!%p247_p2), %vm870_vm0, %v869_v1  ;;  %795 = vmatprep.mubr.msk.bf16.mxu1 (!%p247_p2), %vm870_vm0, %v869_v1 }
   0xb   : > { %762 = vmatpush3.bf16.msra.mxu0 (!%p247_p2), %v850_v2  ;;  %782 = vmatpush3.bf16.msra.mxu1 (!%p247_p2), %v850_v2 }
   0xc   : > { %763 = vmatprep.subr.bf16.mxu0 (!%p247_p2), %v869_v1  ;;  %783 = vmatprep.subr.bf16.mxu1 (!%p247_p2), %v869_v1 }
   0xd   : > { %s1027_s27 = smov (!%p292_p3, %s698_s27), 3 }
   0xe   : > { %s936_s30 = sshll.u32 %s1027_s27, 2  ;;  %s707_s13 = sshll.u32 %s1027_s27, 3 }
   0xf   : > { %s295_s9 = scalar_lea.vmem %s1019_s0, %s936_s30  ;;  %s301_s12 = scalar_lea.vmem %s1020_s1, %s936_s30  ;;  %764 = vmatpush3.bf16.msra.mxu0 %v851_v3  ;;  %784 = vmatpush3.bf16.msra.mxu1 %v851_v3 }
  0x10   : > { %s307_s17 = scalar_lea.vmem %s1021_s2, %s936_s30  ;;  %765 = vmatprep.subr.bf16.mxu0 %v869_v1  ;;  %785 = vmatprep.subr.bf16.mxu1 %v869_v1  ;;  %s313_s20 = scalar_lea.vmem %s1022_s3, %s936_s30  ;;  %v857_v9 = vld [vmem:[%s295_s9] sm:$0xff]  }
  0x11   : > { %v858_v10 = vld [vmem:[%s301_s12] sm:$0xff]   ;;  %s319_s16 = scalar_lea.vmem %s1025_s6, %s707_s13 }
  0x12   : > { %v859_v11 = vld [vmem:[%s307_s17] sm:$0xff]  }
  0x13   : > { %766 = vmatpush3.bf16.msra.mxu0 %v852_v4  ;;  %786 = vmatpush3.bf16.msra.mxu1 %v852_v4  ;;  %v860_v12 = vld [vmem:[%s313_s20] sm:$0xff]  }
  0x14   : > { %767 = vmatprep.subr.bf16.mxu0 %v869_v1  ;;  %787 = vmatprep.subr.bf16.mxu1 %v869_v1 }
  0x17   : > { %768 = vmatpush3.bf16.msra.mxu0 %v853_v5  ;;  %788 = vmatpush3.bf16.msra.mxu1 %v853_v5 }
  0x18   : > { %769 = vmatprep.subr.bf16.mxu0 %v869_v1  ;;  %789 = vmatprep.subr.bf16.mxu1 %v869_v1 }
  0x1b   : > { %770 = vmatpush3.bf16.msra.mxu0 %v854_v6  ;;  %790 = vmatpush3.bf16.msra.mxu1 %v854_v6 }
  0x1c   : > { %771 = vmatprep.subr.bf16.mxu0 %v869_v1  ;;  %791 = vmatprep.subr.bf16.mxu1 %v869_v1 }
  0x1f   : > { %772 = vmatpush3.bf16.msra.mxu0 %v855_v7  ;;  %792 = vmatpush3.bf16.msra.mxu1 %v855_v7 }
  0x20   : > { %773 = vmatprep.subr.bf16.mxu0 %v869_v1  ;;  %793 = vmatprep.subr.bf16.mxu1 %v869_v1 }
  0x23   : > { %774 = vmatpush3.bf16.msra.mxu0 %v856_v8  ;;  %794 = vmatpush3.bf16.msra.mxu1 %v856_v8 }
  0x24   : > { %799 = vmatprep.subr.bf16.mxu0 %v869_v1  ;;  %819 = vmatprep.subr.bf16.mxu1 %v869_v1 }
  0x26   : > { %776 = vmatmul.mubr.bf16.vlgmr.msra.gmra.mrb[0].mxu0 %v857_v9  ;;  %796 = vmatmul.mubr.bf16.vlgmr.msra.gmra.mrb[0].mxu1 %v858_v10 }
  0x27   : > { %800 = vmatpush3.bf16.msra.mxu0 %v849_v0  ;;  %820 = vmatpush3.bf16.msra.mxu1 %v849_v0 }
  0x28   : > { %801 = vmatprep.subr.bf16.mxu0 %v869_v1  ;;  %821 = vmatprep.subr.bf16.mxu1 %v869_v1 }
  0x29   : > { %815 = vmatprep.mubr.msk.bf16.mxu0 %vm870_vm0, %v869_v1  ;;  %835 = vmatprep.mubr.msk.bf16.mxu1 %vm870_vm0, %v869_v1 }
  0x2b   : > { %802 = vmatpush3.bf16.msra.mxu0 %v850_v2  ;;  %822 = vmatpush3.bf16.msra.mxu1 %v850_v2 }
  0x2c   : > { %803 = vmatprep.subr.bf16.mxu0 %v869_v1  ;;  %823 = vmatprep.subr.bf16.mxu1 %v869_v1 }
  0x2f   : > { %804 = vmatpush3.bf16.msra.mxu0 %v851_v3  ;;  %824 = vmatpush3.bf16.msra.mxu1 %v851_v3 }
  0x30   : > { %805 = vmatprep.subr.bf16.mxu0 %v869_v1  ;;  %825 = vmatprep.subr.bf16.mxu1 %v869_v1 }
  0x33   : > { %806 = vmatpush3.bf16.msra.mxu0 %v852_v4  ;;  %826 = vmatpush3.bf16.msra.mxu1 %v852_v4 }
  0x34   : > { %807 = vmatprep.subr.bf16.mxu0 %v869_v1  ;;  %827 = vmatprep.subr.bf16.mxu1 %v869_v1 }
  0x37   : > { %808 = vmatpush3.bf16.msra.mxu0 %v853_v5  ;;  %828 = vmatpush3.bf16.msra.mxu1 %v853_v5 }
  0x38   : > { %809 = vmatprep.subr.bf16.mxu0 %v869_v1  ;;  %829 = vmatprep.subr.bf16.mxu1 %v869_v1 }
  0x3b   : > { %810 = vmatpush3.bf16.msra.mxu0 %v854_v6  ;;  %830 = vmatpush3.bf16.msra.mxu1 %v854_v6 }
  0x3c   : > { %811 = vmatprep.subr.bf16.mxu0 %v869_v1  ;;  %831 = vmatprep.subr.bf16.mxu1 %v869_v1 }
  0x3f   : > { %812 = vmatpush3.bf16.msra.mxu0 %v855_v7  ;;  %832 = vmatpush3.bf16.msra.mxu1 %v855_v7 }
  0x40   : > { %813 = vmatprep.subr.bf16.mxu0 %v869_v1  ;;  %833 = vmatprep.subr.bf16.mxu1 %v869_v1 }
  0x43   : > { %814 = vmatpush3.bf16.msra.mxu0 %v856_v8  ;;  %834 = vmatpush3.bf16.msra.mxu1 %v856_v8 }
  0x46   : > { %816 = vmatmul.mubr.bf16.vlgmr.msra.gmra.mrb[4].mxu0 %v859_v11  ;;  %836 = vmatmul.mubr.bf16.vlgmr.msra.gmra.mrb[4].mxu1 %v860_v12 }
  0xf9   : > { %v428_v13 = vpop.f32.mrb[0].mxu0  ;;  %v477_v14 = vpop.f32.mrb[0].mxu1 }
  0xfa   : > { %v582_v15 = vmax.f32 %v428_v13, %v477_v14  ;;  %v777_v16 = vpop.f32.mrb[1].mxu0  ;;  %v797_v17 = vpop.f32.mrb[1].mxu1 }
  0xfb   : > { %v431_v18 = vpop.f32.mrb[2].mxu0  ;;  %v480_v19 = vpop.f32.mrb[2].mxu1 }
  0xfc   : > { %v583_v20 = vmax.f32 %v431_v18, %v480_v19  ;;  %v778_v21 = vpop.f32.mrb[3].mxu0  ;;  %v798_v22 = vpop.f32.mrb[3].mxu1 }
 0x119   : > { %v526_v23 = vpop.f32.mrb[4].mxu0  ;;  %v575_v24 = vpop.f32.mrb[4].mxu1 }
 0x11a   : > { %v584_v25 = vmax.f32 %v526_v23, %v575_v24  ;;  %v817_v26 = vpop.f32.mrb[5].mxu0  ;;  %v837_v27 = vpop.f32.mrb[5].mxu1 }
 0x11b   : > { %v529_v29 = vpop.f32.mrb[6].mxu0  ;;  %v578_v30 = vpop.f32.mrb[6].mxu1 }
 0x11c   : > { %v586_v31 = vmax.f32 %v582_v15, %v584_v25  ;;  %v585_v32 = vmax.f32 %v529_v29, %v578_v30  ;;  %v818_v33 = vpop.f32.mrb[7].mxu0  ;;  %v838_v34 = vpop.f32.mrb[7].mxu1 }
 0x11e   : > { %v595_v35 = vadd.f32 %v720_v28, %v586_v31  ;;  %v587_v36 = vmax.f32 %v583_v20, %v585_v32 }
 0x120   : > { %v597_v37 = vmax.f32 %v595_v35, 0.0  ;;  %v596_v38 = vadd.f32 %v720_v28, %v587_v36 }
 0x122   : > { %599 = vst [vmem:[%s319_s16] sm:$0xff] %v597_v37  ;;  %v598_v39 = vmax.f32 %v596_v38, 0.0 }
 0x124   : > { %600 = vst [vmem:[%s319_s16 + $0x8] sm:$0xff] %v598_v39 }
 0x125 PF: > { %s16_s21 = sadd.s32 1, %s867_s21  }
 0x126   : > { %p13_p4 = scmp.ge.s32.totalorder %s16_s21, 4  }
 0x128   :  { %15 = sbr.rel (!%p13_p4) target bundleno = 1 (0x1), region = 83 }

// kernel: parameter_server_forward.5
= control target key start
LH: loop header
LB: loop body
LE: loop exit
PB: predicated region body
PF: predicated region fallthrough
CT: control target
= control target key end

     0   :  { %v429_v1 = vmov 0.0   ;;  %vm430_vm0 = vmmov 0   ;;  %s554_s1 = inlined_call_operand.vmem [shape: bf16[256,128], index: 1, kind: input, shape index: {}]   ;;  %s555_s0 = inlined_call_operand.vmem [shape: bf16[8,256], index: 0, kind: input, shape index: {}]   ;;  %s556_s3 = inlined_call_operand.vmem [shape: bf16[128,128], index: 3, kind: input, shape index: {}]   ;;  %s557_s2 = inlined_call_operand.vmem [shape: f32[1,128], index: 2, kind: input, shape index: {}]   ;;  %s558_s4 = inlined_call_operand.vmem [shape: f32[1,128], index: 4, kind: input, shape index: {}]   ;;  %s559_s5 = inlined_call_operand.vmem [shape: f32[8,128], index: 5, kind: output, shape index: {}]  }
   0x1   :  { %v403_v0 = vld [vmem:[%s554_s1 + $0x40] sm:$0xff]   ;;  %381 = vmatprep.subr.bf16.mxu1 %v429_v1  ;;  %v405_v3 = vld [vmem:[%s554_s1 + $0x48] sm:$0xff]   ;;  %v407_v5 = vld [vmem:[%s554_s1 + $0x50] sm:$0xff]   ;;  %397 = vmatprep.mubr.msk.bf16.mxu1 %vm430_vm0, %v429_v1 }
   0x2   :  { %v404_v2 = vld [vmem:[%s554_s1] sm:$0xff]   ;;  %350 = vmatprep.subr.bf16.mxu0 %v403_v0  ;;  %v406_v4 = vld [vmem:[%s554_s1 + $0x8] sm:$0xff]   ;;  %v408_v6 = vld [vmem:[%s554_s1 + $0x10] sm:$0xff]  }
   0x3   :  { %351 = vmatpush3.bf16.msra.mxu0 %v404_v2  ;;  %v409_v7 = vld [vmem:[%s554_s1 + $0x58] sm:$0xff]   ;;  %v411_v9 = vld [vmem:[%s554_s1 + $0x60] sm:$0xff]   ;;  %v413_v11 = vld [vmem:[%s554_s1 + $0x68] sm:$0xff]  }
   0x4   :  { %352 = vmatprep.subr.bf16.mxu0 %v405_v3  ;;  %v410_v8 = vld [vmem:[%s554_s1 + $0x18] sm:$0xff]   ;;  %v412_v10 = vld [vmem:[%s554_s1 + $0x20] sm:$0xff]   ;;  %v414_v15 = vld [vmem:[%s554_s1 + $0x28] sm:$0xff]  }
   0x5   :  { %v21_v12 = vld [vmem:[%s555_s0] sm:$0xff]  ;;  %v415_v16 = vld [vmem:[%s554_s1 + $0x70] sm:$0xff]   ;;  %v422_v17 = vld [vmem:[%s556_s3 + $0x8] sm:$0xff]  }
   0x6   :  { %v324_v13 = vcombine.high %v21_v12, %v21_v12  ;;  %v421_v14 = vld [vmem:[%s556_s3] sm:$0xff]   ;;  %v416_v18 = vld [vmem:[%s554_s1 + $0x30] sm:$0xff]   ;;  %v417_v19 = vld [vmem:[%s554_s1 + $0x78] sm:$0xff]   ;;  %v323_v23 = vcombine.low %v21_v12, %v21_v12 }
   0x7   :  { %353 = vmatpush3.bf16.msra.mxu0 %v406_v4  ;;  %382 = vmatpush3.bf16.msra.mxu1 %v421_v14  ;;  %v423_v20 = vld [vmem:[%s556_s3 + $0x10] sm:$0xff]   ;;  %v418_v21 = vld [vmem:[%s554_s1 + $0x38] sm:$0xff]   ;;  %v425_v24 = vld [vmem:[%s556_s3 + $0x20] sm:$0xff]  }
   0x8   :  { %354 = vmatprep.subr.bf16.mxu0 %v407_v5  ;;  %196 = vmatprep.mubr.bf16.mxu0 %v324_v13  ;;  %v424_v22 = vld [vmem:[%s556_s3 + $0x18] sm:$0xff]   ;;  %v426_v25 = vld [vmem:[%s556_s3 + $0x28] sm:$0xff]   ;;  %v427_v26 = vld [vmem:[%s556_s3 + $0x30] sm:$0xff]  }
   0x9   :  { %383 = vmatprep.subr.bf16.mxu1 %v429_v1  ;;  %v428_v27 = vld [vmem:[%s556_s3 + $0x38] sm:$0xff]   ;;  %v322_v29 = vld [vmem:[%s557_s2] ss:$0 sm:$0xff] }
   0xa   :  { %v341_v37 = vld [vmem:[%s558_s4] ss:$0 sm:$0xff] }
   0xb   :  { %355 = vmatpush3.bf16.msra.mxu0 %v408_v6  ;;  %384 = vmatpush3.bf16.msra.mxu1 %v422_v17 }
   0xc   :  { %356 = vmatprep.subr.bf16.mxu0 %v409_v7  ;;  %385 = vmatprep.subr.bf16.mxu1 %v429_v1 }
   0xf   :  { %357 = vmatpush3.bf16.msra.mxu0 %v410_v8  ;;  %386 = vmatpush3.bf16.msra.mxu1 %v423_v20 }
  0x10   :  { %358 = vmatprep.subr.bf16.mxu0 %v411_v9  ;;  %387 = vmatprep.subr.bf16.mxu1 %v429_v1 }
  0x13   :  { %359 = vmatpush3.bf16.msra.mxu0 %v412_v10  ;;  %388 = vmatpush3.bf16.msra.mxu1 %v424_v22 }
  0x14   :  { %360 = vmatprep.subr.bf16.mxu0 %v413_v11  ;;  %389 = vmatprep.subr.bf16.mxu1 %v429_v1 }
  0x17   :  { %361 = vmatpush3.bf16.msra.mxu0 %v414_v15  ;;  %390 = vmatpush3.bf16.msra.mxu1 %v425_v24 }
  0x18   :  { %362 = vmatprep.subr.bf16.mxu0 %v415_v16  ;;  %391 = vmatprep.subr.bf16.mxu1 %v429_v1 }
  0x1b   :  { %363 = vmatpush3.bf16.msra.mxu0 %v416_v18  ;;  %392 = vmatpush3.bf16.msra.mxu1 %v426_v25 }
  0x1c   :  { %364 = vmatprep.subr.bf16.mxu0 %v417_v19  ;;  %393 = vmatprep.subr.bf16.mxu1 %v429_v1 }
  0x1f   :  { %365 = vmatpush3.bf16.msra.mxu0 %v418_v21  ;;  %394 = vmatpush3.bf16.msra.mxu1 %v427_v26 }
  0x20   :  { %395 = vmatprep.subr.bf16.mxu1 %v429_v1 }
  0x22   :  { %197 = vmatmul.mubr.bf16.vlgmr.msra.gmra.mrb[0].mxu0 %v323_v23 }
  0x23   :  { %396 = vmatpush3.bf16.msra.mxu1 %v428_v27 }
  0xf5   :  { %v366_v28 = vpop.f32.mrb[0].mxu0 }
  0xf6   :  { %v367_v30 = vpop.f32.mrb[1].mxu0 }
  0xf7   :  { %v368_v31 = vadd.f32 %v367_v30, %v366_v28  ;;  %v369_v32 = vpop.f32.mrb[2].mxu0 }
  0xf8   :  { %v370_v33 = vpop.f32.mrb[3].mxu0 }
  0xf9   :  { %v199_v34 = vadd.f32 %v368_v31, %v322_v29 }
  0xfb   :  { %v204_v35 = vmax.f32 %v199_v34, 0.0 }
  0xfd   :  { %v205_v36 = vpack.c.bf16 %v204_v35, %v204_v35 }
  0xff   :  { %398 = vmatmul.mubr.bf16.vlgmr.msra.gmra.mrb[0].mxu1 %v205_v36 }
 0x1d2   :  { %v311_v38 = vpop.f32.mrb[0].mxu1 }
 0x1d3   :  { %v312_v39 = vadd.f32 %v341_v37, %v311_v38  ;;  %v399_v40 = vpop.f32.mrb[1].mxu1 }
 0x1d4   :  { %v314_v41 = vpop.f32.mrb[2].mxu1 }
 0x1d5   :  { %317 = vst [vmem:[%s559_s5] sm:$0xff] %v312_v39  ;;  %v400_v42 = vpop.f32.mrb[3].mxu1 }

</bundles_post_ra>
